<compile_context>
chip_gen: v7x
topology: tpu7x:2x2x1
jax: 0.10.0
libtpu: 0.0.40
codegen_flags: <defaults>
</compile_context>

<pallas_src>
import functools
import itertools

import jax
import jax.numpy as jnp
from jax.experimental import pallas as pl
from jax.experimental.pallas import tpu as pltpu


def _round_up(x, m):
    return ((x + m - 1) // m) * m


# --------------------------------------------------------- generic matmul --
# Used only for the tiny SE-MLP matmuls and the final FC (f32 operands).
def _matmul_kernel(a_ref, b_ref, o_ref, acc_ref):
    @pl.when(pl.program_id(2) == 0)
    def _():
        acc_ref[...] = jnp.zeros_like(acc_ref)

    acc_ref[...] += jnp.dot(a_ref[...], b_ref[...],
                            preferred_element_type=jnp.float32)

    @pl.when(pl.program_id(2) == pl.num_programs(2) - 1)
    def _():
        o_ref[...] = acc_ref[...].astype(o_ref.dtype)


def pallas_matmul(a, b):
    """(M, K) @ (K, N) -> (M, N), f32 accumulation on the MXU."""
    M, K = a.shape
    K2, N = b.shape
    assert K == K2
    if M >= 256:
        tm, Mp = 256, _round_up(M, 256)
    elif M >= 128:
        tm, Mp = 128, _round_up(M, 128)
    else:
        Mp = _round_up(M, 8)
        tm = Mp
    if N >= 128:
        Np, tn = _round_up(N, 128), 128
    else:
        Np, tn = N, N
    if K >= 8192 and K % 8192 == 0:
        tk, Kp = 8192, K
    elif K >= 1024 and K % 1024 == 0:
        tk, Kp = 1024, K
    elif K > 512:
        tk, Kp = 512, _round_up(K, 512)
    else:
        Kp = _round_up(K, 8)
        tk = Kp
    a = jnp.pad(a, ((0, Mp - M), (0, Kp - K)))
    b = jnp.pad(b, ((0, Kp - K), (0, Np - N)))
    out = pl.pallas_call(
        _matmul_kernel,
        out_shape=jax.ShapeDtypeStruct((Mp, Np), jnp.float32),
        grid=(Mp // tm, Np // tn, Kp // tk),
        in_specs=[pl.BlockSpec((tm, tk), lambda i, j, k: (i, k)),
                  pl.BlockSpec((tk, tn), lambda i, j, k: (k, j))],
        out_specs=pl.BlockSpec((tm, tn), lambda i, j, k: (i, j)),
        scratch_shapes=[pltpu.VMEM((tm, tn), jnp.float32)],
        compiler_params=pltpu.CompilerParams(
            dimension_semantics=("parallel", "parallel", "arbitrary")),
    )(a, b)
    return out[:M, :N]


# ----------------------------------------- fused conv(+BN)(+ReLU) matmul --
def _conv_bn_kernel(a_ref, b_ref, s_ref, c_ref, o_ref, *, relu):
    y = jnp.dot(a_ref[...], b_ref[0], preferred_element_type=jnp.float32)
    y = y * s_ref[...] + c_ref[...]
    if relu:
        y = jnp.maximum(y, 0.0)
    o_ref[...] = y.astype(o_ref.dtype)


def _extract_patches(x, kh, kw, stride, pad):
    """NHWC x -> (N*Ho*Wo, Cin*kh*kw) with (cin, i, j) flattening order."""
    N, H, W, C = x.shape
    if pad > 0:
        x = jnp.pad(x, ((0, 0), (pad, pad), (pad, pad), (0, 0)))
    Hp, Wp = H + 2 * pad, W + 2 * pad
    Ho = (Hp - kh) // stride + 1
    Wo = (Wp - kw) // stride + 1
    cols = []
    for i in range(kh):
        for j in range(kw):
            cols.append(x[:, i:i + stride * (Ho - 1) + 1:stride,
                          j:j + stride * (Wo - 1) + 1:stride, :])
    p = jnp.stack(cols, axis=-1)                 # (N, Ho, Wo, C, kh*kw)
    return p.reshape(N * Ho * Wo, C * kh * kw), Ho, Wo


def _grouped_slab_weights(w, groups, tn):
    """torch (Cout, Cg, kh, kw) grouped weight -> per-output-tile block-diag
    slabs of shape (nj, gpt*Kg, tn); only the groups of each tile appear."""
    Cout, Cg, kh, kw = w.shape
    cog = Cout // groups
    assert tn % cog == 0 and Cout % tn == 0
    gpt = tn // cog
    nj = Cout // tn
    Kg = Cg * kh * kw
    # per-group matmul weight (G, Kg, cog); row order (cg, tap) matches im2col
    wg = w.reshape(groups, cog, Cg, kh * kw).transpose(0, 2, 3, 1)
    wg = wg.reshape(nj, gpt, Kg, cog)
    eye = jnp.eye(gpt, dtype=w.dtype)
    slab = jnp.einsum("ngkc,gh->ngkhc", wg, eye)  # block-diag within each tile
    return slab.reshape(nj, gpt * Kg, gpt * cog)


def conv2d_bn(x, w, bn, relu, stride=1, padding=0, groups=1):
    """Conv2d (no bias, torch weight layout) + eval-mode BN (+ReLU), NHWC.

    Lowered to a single fused Pallas matmul: bf16 operands, f32 accumulation,
    per-output-channel scale/bias (+ReLU) applied in the epilogue.  Grouped
    convs use a group-slab block-diagonal weight so that only the K columns
    of the current output tile's groups are streamed through the MXU.
    """
    N, H, W, Cin = x.shape
    Cout, _, kh, kw = w.shape
    scale = bn["gamma"] * jax.lax.rsqrt(bn["var"] + 1e-5)
    bias = bn["beta"] - bn["mean"] * scale
    scale = scale.reshape(1, Cout).astype(jnp.float32)
    bias = bias.reshape(1, Cout).astype(jnp.float32)

    if kh == 1 and kw == 1 and groups == 1:
        if stride > 1:
            x = x[:, ::stride, ::stride, :]
        Ho, Wo = x.shape[1], x.shape[2]
        a = x.reshape(N * Ho * Wo, Cin)
    else:
        a, Ho, Wo = _extract_patches(x, kh, kw, stride, padding)
    a = a.astype(jnp.bfloat16)
    M, K = a.shape

    if groups == 1:
        if Cout % 256 == 0:
            tn = 256                     # fill the 256-wide MXU on v6e/v7x
        elif Cout % 128 == 0:
            tn = 128
        else:
            tn = Cout
        nj = Cout // tn
        wm = w.reshape(Cout, K).T        # (K, Cout); row order matches im2col
        Kp = _round_up(K, 8)
        if Kp != K:                      # only the 7x7 stem (K=147)
            a = jnp.pad(a, ((0, 0), (0, Kp - K)))
            wm = jnp.pad(wm, ((0, Kp - K), (0, 0)))
        b3 = wm.reshape(Kp, nj, tn).transpose(1, 0, 2)   # (nj, Kp, tn)
        a_index = lambda i, j: (i, 0)    # A tile reused across j (weights move)
    else:
        tn = 128                         # keep slab density at 1/(128/cog)
        nj = Cout // tn
        b3 = _grouped_slab_weights(w, groups, tn)        # (nj, Kb, tn)
        assert b3.shape[0] * b3.shape[1] == K
        a_index = lambda i, j: (i, j)    # K-slab of tile j only
    b3 = b3.astype(jnp.bfloat16)
    Kb = b3.shape[1]

    tm = 256 if M >= 256 else _round_up(M, 8)
    Mp = _round_up(M, tm)
    if Mp != M:
        a = jnp.pad(a, ((0, Mp - M), (0, 0)))

    out = pl.pallas_call(
        functools.partial(_conv_bn_kernel, relu=relu),
        out_shape=jax.ShapeDtypeStruct((Mp, Cout), jnp.bfloat16),
        grid=(Mp // tm, nj),
        in_specs=[pl.BlockSpec((tm, Kb), a_index),
                  pl.BlockSpec((1, Kb, tn), lambda i, j: (j, 0, 0)),
                  pl.BlockSpec((1, tn), lambda i, j: (0, j)),
                  pl.BlockSpec((1, tn), lambda i, j: (0, j))],
        out_specs=pl.BlockSpec((tm, tn), lambda i, j: (i, j)),
        compiler_params=pltpu.CompilerParams(
            dimension_semantics=("parallel", "parallel")),
    )(a, b3, scale, bias)
    return out[:M].reshape(N, Ho, Wo, Cout)


# ------------------------------------------ fused SE gate + residual + ReLU --
def _se_gate_kernel(x_ref, se_ref, r_ref, o_ref):
    s = jax.nn.sigmoid(se_ref[...].astype(jnp.float32))
    y = x_ref[...].astype(jnp.float32) * s + r_ref[...].astype(jnp.float32)
    o_ref[...] = jnp.maximum(y, 0.0).astype(o_ref.dtype)


def se_scale_add_relu(x, se_logits, residual):
    """x, residual: (N, HW, C) bf16; se_logits: (N, 1, C) f32."""
    N, HW, C = x.shape
    TR = next(t for t in (512, 256, 128, 64, 32, 16, 8, 4, 2, 1) if HW % t == 0)
    return pl.pallas_call(
        _se_gate_kernel,
        out_shape=jax.ShapeDtypeStruct((N, HW, C), x.dtype),
        grid=(N, HW // TR),
        in_specs=[pl.BlockSpec((1, TR, C), lambda n, t: (n, t, 0)),
                  pl.BlockSpec((1, 1, C), lambda n, t: (n, 0, 0)),
                  pl.BlockSpec((1, TR, C), lambda n, t: (n, t, 0))],
        out_specs=pl.BlockSpec((1, TR, C), lambda n, t: (n, t, 0)),
        compiler_params=pltpu.CompilerParams(
            dimension_semantics=("parallel", "parallel")),
    )(x, se_logits, residual)


# ------------------------------------------------------- SE global avg pool --
def _mean_pool_kernel(x_ref, o_ref, acc_ref, *, inv_l):
    @pl.when(pl.program_id(1) == 0)
    def _():
        acc_ref[...] = jnp.zeros_like(acc_ref)

    acc_ref[...] += jnp.sum(x_ref[...].astype(jnp.float32), axis=1,
                            keepdims=True)

    @pl.when(pl.program_id(1) == pl.num_programs(1) - 1)
    def _():
        o_ref[...] = acc_ref[...] * inv_l


def mean_pool(x):
    """x: (B, L, C) bf16 -> (B, C) f32, mean over L."""
    B, L, C = x.shape
    budget = max(8, (2 * 1024 * 1024) // (2 * C))
    TL = next((t for t in (4096, 2048, 1024, 512, 256, 128, 64, 32, 16, 8)
               if L % t == 0 and t <= budget), None)
    if TL is None:
        TL = next(t for t in (8, 4, 2, 1) if L % t == 0)
    out = pl.pallas_call(
        functools.partial(_mean_pool_kernel, inv_l=1.0 / L),
        out_shape=jax.ShapeDtypeStruct((B, 1, C), jnp.float32),
        grid=(B, L // TL),
        in_specs=[pl.BlockSpec((1, TL, C), lambda b, t: (b, t, 0))],
        out_specs=pl.BlockSpec((1, 1, C), lambda b, t: (b, 0, 0)),
        scratch_shapes=[pltpu.VMEM((1, 1, C), jnp.float32)],
        compiler_params=pltpu.CompilerParams(
            dimension_semantics=("parallel", "arbitrary")),
    )(x)
    return out.reshape(B, C)


# ----------------------------------------------------- separable max pooling --
def _max3_kernel(a_ref, b_ref, c_ref, o_ref):
    o_ref[...] = jnp.maximum(jnp.maximum(a_ref[...], b_ref[...]), c_ref[...])


def pallas_max3(a, b, c):
    """Elementwise max of three (M, L) arrays (L lane-dense)."""
    M, L = a.shape
    TR = 32 if M >= 32 else _round_up(M, 8)
    Mp = _round_up(M, TR)
    pad = ((0, Mp - M), (0, 0))
    a = jnp.pad(a, pad)
    b = jnp.pad(b, pad)
    c = jnp.pad(c, pad)
    out = pl.pallas_call(
        _max3_kernel,
        out_shape=jax.ShapeDtypeStruct((Mp, L), a.dtype),
        grid=(Mp // TR,),
        in_specs=[pl.BlockSpec((TR, L), lambda i: (i, 0)),
                  pl.BlockSpec((TR, L), lambda i: (i, 0)),
                  pl.BlockSpec((TR, L), lambda i: (i, 0))],
        out_specs=pl.BlockSpec((TR, L), lambda i: (i, 0)),
        compiler_params=pltpu.CompilerParams(
            dimension_semantics=("parallel",)),
    )(a, b, c)
    return out[:M]


def maxpool_3x3_s2_ceil(x):
    """nn.MaxPool2d(3, stride=2, ceil_mode=True) on NHWC x (separable)."""
    N, H, W, C = x.shape
    Ho = -(-(H - 3) // 2) + 1
    Wo = -(-(W - 3) // 2) + 1
    pad_h = (Ho - 1) * 2 + 3 - H
    pad_w = (Wo - 1) * 2 + 3 - W
    xp = jnp.pad(x, ((0, 0), (0, pad_h), (0, pad_w), (0, 0)),
                 constant_values=-jnp.inf)
    Hp = H + pad_h
    # pass 1: 3-tap max along W (stride 2); lane dim = Wo*C (lane-dense)
    va = [xp[:, :, j:j + 2 * (Wo - 1) + 1:2, :].reshape(N * Hp, Wo * C)
          for j in range(3)]
    wmax = pallas_max3(*va).reshape(N, Hp, Wo, C)
    # pass 2: 3-tap max along H (stride 2)
    vb = [wmax[:, i:i + 2 * (Ho - 1) + 1:2, :, :].reshape(N * Ho, Wo * C)
          for i in range(3)]
    out = pallas_max3(*vb).reshape(N, Ho, Wo, C)
    return out


# ------------------------------------------------ separable 7x7 avg pooling --
def _avgpool7_kernel(x_ref, o_ref, *, hk, wk):
    x = x_ref[0].astype(jnp.float32)           # (H, W, C)
    Hdim, Wdim = x.shape[0], x.shape[1]
    Ho = Hdim - (hk - 1)
    rs = x[0:Ho]
    for i in range(1, hk):                      # 7-tap sum along H
        rs = rs + x[i:i + Ho]
    acc = rs
    for j in range(1, wk):                      # 7-tap sum along W via roll
        acc = acc + pltpu.roll(rs, shift=Wdim - j, axis=1)
    o_ref[0] = acc * (1.0 / (hk * wk))          # cols >= Wo are garbage


def avgpool_7x7_s1(x):
    """nn.AvgPool2d(7, stride=1) on NHWC x; returns f32."""
    N, H, W, C = x.shape
    Ho, Wo = H - 6, W - 6
    out = pl.pallas_call(
        functools.partial(_avgpool7_kernel, hk=7, wk=7),
        out_shape=jax.ShapeDtypeStruct((N, Ho, W, C), jnp.float32),
        grid=(N,),
        in_specs=[pl.BlockSpec((1, H, W, C), lambda n: (n, 0, 0, 0))],
        out_specs=pl.BlockSpec((1, Ho, W, C), lambda n: (n, 0, 0, 0)),
        compiler_params=pltpu.CompilerParams(
            dimension_semantics=("parallel",)),
    )(x)
    return out[:, :, :Wo, :]                    # drop the wrapped columns


# -------------------------------------------------------------- SE / blocks --
def se_module_logits(out_nhwc, p):
    N, H, W, C = out_nhwc.shape
    pooled = mean_pool(out_nhwc.reshape(N, H * W, C))        # (N, C) f32
    c_red = p["w1"].shape[0]
    h1 = pallas_matmul(pooled, p["w1"].reshape(c_red, C).T) + p["b1"]
    h1 = jnp.maximum(h1, 0.0)
    h2 = pallas_matmul(h1, p["w2"].reshape(C, c_red).T) + p["b2"]
    return h2                                   # sigmoid fused downstream


def bottleneck(x, p, stride):
    residual = x
    out = conv2d_bn(x, p["conv1_w"], p["bn1"], relu=True)
    out = conv2d_bn(out, p["conv2_w"], p["bn2"], relu=True,
                    stride=stride, padding=1, groups=32)
    out = conv2d_bn(out, p["conv3_w"], p["bn3"], relu=False)
    if "down_w" in p:
        residual = conv2d_bn(x, p["down_w"], p["down_bn"], relu=False,
                             stride=stride)
    se_logits = se_module_logits(out, p["se"])
    N, H, W, C = out.shape
    y = se_scale_add_relu(out.reshape(N, H * W, C),
                          se_logits.reshape(N, 1, C),
                          residual.reshape(N, H * W, C))
    return y.reshape(N, H, W, C)


# --------------------------------------------------------------- parameters --
def make_params(n_classes=2, seed=42):
    key = jax.random.PRNGKey(seed)
    counter = itertools.count()

    def nk():
        return jax.random.fold_in(key, next(counter))

    def conv_w(cout, cin_g, kh, kw):
        fan_in = cin_g * kh * kw
        return (jax.random.normal(nk(), (cout, cin_g, kh, kw), jnp.float32)
                * jnp.sqrt(2.0 / fan_in))

    def bn_p(c):
        return {
            "gamma": 1.0 + 0.1 * jax.random.normal(nk(), (c,), jnp.float32),
            "beta": 0.1 * jax.random.normal(nk(), (c,), jnp.float32),
            "mean": 0.1 * jax.random.normal(nk(), (c,), jnp.float32),
            "var": jax.random.uniform(nk(), (c,), jnp.float32, 0.5, 1.5),
        }

    params = {"conv1_w": conv_w(64, 3, 7, 7), "bn1": bn_p(64)}
    layers = []
    inplanes = 64
    cfg = [(64, 3, 1), (128, 4, 2), (256, 6, 2), (512, 3, 2)]
    for planes, blocks, stride in cfg:
        width = (planes * 4 // 64) * 32          # base_width=4, groups=32
        outp = planes * 4
        block_ps = []
        for bi in range(blocks):
            bstride = stride if bi == 0 else 1
            bp = {
                "conv1_w": conv_w(width, inplanes, 1, 1),
                "bn1": bn_p(width),
                "conv2_w": conv_w(width, width // 32, 3, 3),
                "bn2": bn_p(width),
                "conv3_w": conv_w(outp, width, 1, 1),
                "bn3": bn_p(outp),
                "se": {
                    "w1": conv_w(outp // 16, outp, 1, 1),
                    "b1": jnp.zeros((outp // 16,), jnp.float32),
                    "w2": conv_w(outp, outp // 16, 1, 1),
                    "b2": jnp.zeros((outp,), jnp.float32),
                },
            }
            if bi == 0 and (bstride != 1 or inplanes != outp):
                bp["down_w"] = conv_w(outp, inplanes, 1, 1)
                bp["down_bn"] = bn_p(outp)
            block_ps.append(bp)
            inplanes = outp
        layers.append({"stride": stride, "blocks": block_ps})
    params["layers"] = layers
    params["fc_w"] = 0.01 * jax.random.normal(
        nk(), (n_classes, 2048 * 10 * 10), jnp.float32)
    params["fc_b"] = jnp.zeros((n_classes,), jnp.float32)
    return params


# ------------------------------------------------------------------ forward --
def seresnext50_forward(params, x_nchw):
    """x_nchw: (N, 3, 512, 512) float32 -> logits (N, n_classes)."""
    x = jnp.transpose(x_nchw, (0, 2, 3, 1)).astype(jnp.bfloat16)   # NCHW->NHWC
    # layer0
    x = conv2d_bn(x, params["conv1_w"], params["bn1"], relu=True,
                  stride=2, padding=3)
    x = maxpool_3x3_s2_ceil(x)
    # layer1..layer4
    for layer in params["layers"]:
        for bi, bp in enumerate(layer["blocks"]):
            bstride = layer["stride"] if bi == 0 else 1
            x = bottleneck(x, bp, bstride)
    # logits head: AvgPool2d(7,1) (dropout_p=None -> no dropout), flatten, FC
    x = avgpool_7x7_s1(x)                                          # (N,10,10,2048) f32
    N = x.shape[0]
    feats = jnp.transpose(x, (0, 3, 1, 2)).reshape(N, -1)          # torch (C,H,W) flatten
    logits = pallas_matmul(feats, params["fc_w"].T) + params["fc_b"]
    return logits


if __name__ == "__main__":
    params = make_params(n_classes=2, seed=42)
    # 204800-feature last_linear => 3x512x512 input (batch kept at 1).
    x = jax.random.normal(jax.random.PRNGKey(0), (1, 3, 512, 512), jnp.float32)
    out = seresnext50_forward(params, x)
    out = jax.block_until_ready(out)
    assert out.shape == (1, 2)
    print("KERNEL_OK")
</pallas_src>

<mosaic_0001>
module attributes {stable_mosaic.version = 11 : i64} {
  func.func @_conv_bn_kernel(%arg0: i32, %arg1: i32, %arg2: memref<256x152xbf16, #tpu.memory_space<vmem>>, %arg3: memref<1x152x64xbf16, #tpu.memory_space<vmem>>, %arg4: memref<1x64xf32, #tpu.memory_space<vmem>>, %arg5: memref<1x64xf32, #tpu.memory_space<vmem>>, %arg6: memref<256x64xbf16, #tpu.memory_space<vmem>>) attributes {dimension_semantics = [#tpu.dimension_semantics<parallel>, #tpu.dimension_semantics<parallel>], iteration_bounds = array<i64: 256, 1>, scalar_prefetch = 0 : i64, scratch_operands = 0 : i64, tpu.core_type = #tpu.core_type<tc>, window_params = [{transform_indices = @transform_0, window_bounds = array<i64: 256, 152>}, {transform_indices = @transform_1, window_bounds = array<i64: 1, 152, 64>}, {transform_indices = @transform_2, window_bounds = array<i64: 1, 64>}, {transform_indices = @transform_3, window_bounds = array<i64: 1, 64>}, {transform_indices = @transform_4, window_bounds = array<i64: 256, 64>}]} {
    %c0 = arith.constant 0 : index
    %c0_0 = arith.constant 0 : index
    %0 = vector.load %arg2[%c0, %c0_0] : memref<256x152xbf16, #tpu.memory_space<vmem>>, vector<256x152xbf16>
    %c0_1 = arith.constant 0 : index
    %c0_2 = arith.constant 0 : index
    %c0_3 = arith.constant 0 : index
    %1 = vector.load %arg3[%c0_1, %c0_2, %c0_3] : memref<1x152x64xbf16, #tpu.memory_space<vmem>>, vector<1x152x64xbf16>
    %2 = vector.shape_cast %1 : vector<1x152x64xbf16> to vector<152x64xbf16>
    %cst = arith.constant dense<0.000000e+00> : vector<256x64xf32>
    %3 = tpu.matmul %0, %2, %cst {dimension_numbers = #tpu.dot_dimension_numbers<[1], [0], [0], [1], [0, 0, 1, 1], [], []>} : vector<256x152xbf16>, vector<152x64xbf16>, vector<256x64xf32> -> vector<256x64xf32>
    %c0_4 = arith.constant 0 : index
    %c0_5 = arith.constant 0 : index
    %4 = vector.load %arg4[%c0_4, %c0_5] : memref<1x64xf32, #tpu.memory_space<vmem>>, vector<1x64xf32>
    %5 = vector.broadcast %4 : vector<1x64xf32> to vector<256x64xf32>
    %6 = arith.mulf %3, %5 : vector<256x64xf32>
    %c0_6 = arith.constant 0 : index
    %c0_7 = arith.constant 0 : index
    %7 = vector.load %arg5[%c0_6, %c0_7] : memref<1x64xf32, #tpu.memory_space<vmem>>, vector<1x64xf32>
    %8 = vector.broadcast %7 : vector<1x64xf32> to vector<256x64xf32>
    %9 = arith.addf %6, %8 : vector<256x64xf32>
    %cst_8 = arith.constant 0.000000e+00 : f32
    %10 = vector.broadcast %cst_8 : f32 to vector<256x64xf32>
    %11 = arith.maximumf %9, %10 : vector<256x64xf32>
    %12 = arith.truncf %11 : vector<256x64xf32> to vector<256x64xbf16>
    %c0_9 = arith.constant 0 : index
    %c0_10 = arith.constant 0 : index
    %13 = vector.load %arg6[%c0_9, %c0_10] : memref<256x64xbf16, #tpu.memory_space<vmem>>, vector<256x64xbf16>
    tpu.vector_store %arg6[%c0_9, %c0_10], %12 {strides = array<i32>} : memref<256x64xbf16, #tpu.memory_space<vmem>>, vector<256x64xbf16>,
    return
  }
  func.func @transform_0(%arg0: i32, %arg1: i32) -> (i32, i32) {
    %c0_i32 = arith.constant 0 : i32
    %c0_i32_0 = arith.constant 0 : i32
    return %arg0, %c0_i32 : i32, i32
  }
  func.func @transform_1(%arg0: i32, %arg1: i32) -> (i32, i32, i32) {
    %c0_i32 = arith.constant 0 : i32
    %c0_i32_0 = arith.constant 0 : i32
    %c0_i32_1 = arith.constant 0 : i32
    return %arg1, %c0_i32, %c0_i32_0 : i32, i32, i32
  }
  func.func @transform_2(%arg0: i32, %arg1: i32) -> (i32, i32) {
    %c0_i32 = arith.constant 0 : i32
    %c0_i32_0 = arith.constant 0 : i32
    return %c0_i32, %arg1 : i32, i32
  }
  func.func @transform_3(%arg0: i32, %arg1: i32) -> (i32, i32) {
    %c0_i32 = arith.constant 0 : i32
    %c0_i32_0 = arith.constant 0 : i32
    return %c0_i32, %arg1 : i32, i32
  }
  func.func @transform_4(%arg0: i32, %arg1: i32) -> (i32, i32) {
    %c0_i32 = arith.constant 0 : i32
    return %arg0, %arg1 : i32, i32
  }
}

</mosaic_0001>

<bundles_post_ra>
// kernel: tpu_custom_call.1
= control target key start
LH: loop header
LB: loop body
LE: loop exit
PB: predicated region body
PF: predicated region fallthrough
CT: control target
= control target key end

     0   :  { %s2057_s0 = inlined_call_operand.vmem [shape: bf16[65536,152], index: 0, kind: input, shape index: {}]   ;;  %s2058_s1 = inlined_call_operand.hbm [shape: bf16[1,152,64], index: 1, kind: input, shape index: {}]   ;;  %s2059_s2 = inlined_call_operand.hbm [shape: f32[1,64], index: 2, kind: input, shape index: {}]   ;;  %s2060_s3 = inlined_call_operand.hbm [shape: f32[1,64], index: 3, kind: input, shape index: {}]   ;;  %s2061_s4 = inlined_call_operand.hbm [shape: bf16[65536,64], index: 4, kind: output, shape index: {}]  }
   0x1   :  { %2067 = sst [smem:[#allocation13_spill]] %s2059_s2 }
   0x2   :  { %9 = vsyncpa [#allocation3], 0 }
   0x3   :  { %10 = vsyncpa [#allocation6], 0 }
   0x4   :  { %11 = vsyncpa [#allocation4], 0 }
   0x5   :  { %13 = vsyncpa [#allocation4 + $0x1], 0  ;;  %s1661_s15 = smov 0   ;;  %s1663_s16 = smov 0  }
   0x6   :  { %s1665_s17 = smov 0   ;;  %s1667_s18 = smov 0  }
   0x7   :  { %s1669_s19 = smov 0   ;;  %s1671_s20 = smov 0  }
   0x8 LB: > { %s1140_s21 = sadd.s32 4294967295, %s1625_s20   ;;  %s1141_s22 = sadd.s32 4294967294, %s1625_s20   ;;  %s1625_s20 = sphi %s1671_s20, %s19_s20   ;;  %s1621_s19 = sphi %s1669_s19, %s2085_s19   ;;  %s1617_s18 = sphi %s1667_s18, %s2084_s18   ;;  %s1613_s17 = sphi %s1665_s17, %s2083_s17   ;;  %s1609_s16 = sphi %s1663_s16, %s2082_s16   ;;  %s1605_s15 = sphi %s1661_s15, %s2081_s15  }
   0x9   : > { %s31_s23 = sadd.s32 1, %s1621_s19  ;;  %s144_s24 = sadd.s32 1, %s1613_s17 }
   0xa   : > { %p33_p0 = scmp.ge.s32.totalorder %s31_s23, 256  ;;  %p154_p1 = scmp.ne.s32.totalorder %s1613_s17, %s1609_s16 }
   0xb   : > { %p155_p2 = scmp.eq.s32.totalorder %s1140_s21, 255  ;;  %p160_p3 = scmp.ne.s32.totalorder %s1609_s16, %s1605_s15 }
   0xc   : > { %s2087_s23 = smov (%p33_p0, %s31_s23), 0  ;;  %p161_p5 = scmp.eq.s32.totalorder %s1141_s22, 255 }
   0xd   : > { %2068 = sst [smem:[#allocation12_spill]] %s2087_s23  ;;  %p1701_p4 = por %p155_p2, %p154_p1 }
   0xe   : > { %s139_s26 = ssub.s32 %s1621_s19, %s2087_s23  ;;  %p1142_p6 = scmp.ge.s32.totalorder %s1625_s20, 1 }
   0xf   : > { %s2069_s25 = scalar_select %p1701_p4, 1, 0 }
  0x10   : > { %p142_p7 = scmp.eq.s32.totalorder %s139_s26, 0  ;;  %p1708_p8 = por %p161_p5, %p160_p3 }
  0x11   : > { %p168_p9 = scmp.lt.s32.totalorder %s1625_s20, 257  ;;  %p1720_p11 = scmp.eq.s32.totalorder %s1140_s21, 0 }
  0x12   : > { %s2070_s27 = scalar_select %p1708_p8, 1, 0 }
  0x13   : > { %s1714_s28 = scalar_select %p142_p7, %s1613_s17, %s144_s24  }
  0x14   : > { %p1716_p10 = pnand %p1142_p6, %p168_p9  ;;  %s1627_s5 = smov [#allocation5]  }
  0x15   : > { %s2072_s30 = scalar_select %p1720_p11, 1, 0 }
  0x16   : > { %s2071_s29 = scalar_select %p1716_p10, 1, 0 }
  0x17   : > { %p1320_p12 = pneg %p1716_p10  ;;  %s199_s6 = sshll.u32 %s1627_s5, 4  ;;  %s200_s6 = int_to_ptr.vmem [resolvable:$true] %s199_s6 }
  0x18   : > { %s1628_s8 = smov [#allocation2]   ;;  %s2074_s2 = sld [smem:[#allocation13_spill]] }
  0x19   : > { %p1728_p13 = pnand %p1720_p11, %p1320_p12  ;;  %s183_s9 = sshll.u32 %s1628_s8, 4  ;;  %s1732_s9 = int_to_ptr.vmem [resolvable:$true] %s183_s9 }
  0x1b   : > { %p1742_p1 = pneg %p1728_p13 }
  0x1e   : > { %s1455_s12 = scalar_lea.hbm %s2074_s2, 16 }
  0x1f   : > { %p1456_p0 = scmp.ne.s32.totalorder %s2074_s2, %s1455_s12  ;;  %p1462_p5 = scmp.lt.u32.totalorder %s1455_s12, %s2074_s2 }
  0x21   : > { %p1458_p2 = pnand %p1742_p1, %p1456_p0 }
  0x23   : > { %p1459_p3 = pneg %p1458_p2 }
  0x25   : > { %p1464_p6 = pnand %p1462_p5, %p1459_p3 }
  0x27   : > { %1467 = shalt.err (!%p1464_p6)
}
  0x28   : > { %s1468_s26 = scalar_lea.vmem %s200_s6, 16  ;;  %s1475_s5 = scalar_lea.vmem %s200_s6, 32 }
  0x29   : > { %p1469_p7 = scmp.ne.s32.totalorder %s200_s6, %s1468_s26  ;;  %p1476_p8 = scmp.lt.s32.totalorder %s200_s6, %s200_s6 }
  0x2a   : > { %p1477_p4 = scmp.lt.s32.totalorder %s1475_s5, %s1468_s26 }
  0x2b   : > { %p1471_p9 = pnand %p1469_p7, %p1742_p1 }
  0x2c   : > { %p1478_p11 = por %p1477_p4, %p1476_p8 }
  0x2d   : > { %p1472_p12 = pneg %p1471_p9 }
  0x2f   : > { %p1479_p10 = pnand %p1478_p11, %p1472_p12 }
  0x31   : > { %1482 = shalt.err (!%p1479_p10)
}
  0x32   : > { %1326 = dma.hbm_to_vmem [thread:$0]  (!%p1728_p13), %s2074_s2, 16, %s200_s6, [#allocation6]  }
  0x33   : > { %s1483_s13 = scalar_lea.hbm %s2058_s1, 1216 }
  0x34   : > { %p1484_p0 = scmp.ne.s32.totalorder %s2058_s1, %s1483_s13  ;;  %p1490_p8 = scmp.lt.u32.totalorder %s1483_s13, %s2058_s1 }
  0x36   : > { %p1486_p2 = pnand %p1484_p0, %p1742_p1 }
  0x38   : > { %p1487_p4 = pneg %p1486_p2 }
  0x3a   : > { %p1492_p10 = pnand %p1490_p8, %p1487_p4 }
  0x3c   : > { %1495 = shalt.err (!%p1492_p10)
}
  0x3d   : > { %s1496_s6 = scalar_lea.vmem %s1732_s9, 1216  ;;  %p1504_p6 = scmp.lt.s32.totalorder %s1732_s9, %s1732_s9 }
  0x3e   : > { %p1497_p11 = scmp.ne.s32.totalorder %s1732_s9, %s1496_s6  ;;  %p1505_p7 = scmp.lt.s32.totalorder %s1496_s6, %s1496_s6 }
  0x40   : > { %p1499_p3 = pnand %p1497_p11, %p1742_p1  ;;  %p1506_p9 = por %p1505_p7, %p1504_p6 }
  0x42   : > { %p1500_p5 = pneg %p1499_p3 }
  0x44   : > { %p1507_p12 = pnand %p1506_p9, %p1500_p5 }
  0x46   : > { %1510 = shalt.err (!%p1507_p12)
}
  0x47   : > { %s1629_s5 = smov 64   ;;  %s1630_s8 = smov 4  }
  0x48   : > { %1323 = dma.hbm_to_vmem [thread:$0]  (!%p1728_p13), %s2058_s1, 1216, %s1732_s9, [#allocation3], %s1629_s5, %s1629_s5, %s1630_s8  }
  0x49   : > { %s1631_s12 = smov [#allocation7]   ;;  %s1511_s24 = scalar_lea.hbm %s2060_s3, 16 }
  0x4a   : > { %s212_s13 = sshll.u32 %s1631_s12, 4  ;;  %p1512_p0 = scmp.ne.s32.totalorder %s2060_s3, %s1511_s24  ;;  %s213_s13 = int_to_ptr.vmem [resolvable:$true] %s212_s13 }
  0x4b   : > { %p1518_p8 = scmp.lt.u32.totalorder %s1511_s24, %s2060_s3 }
  0x4c   : > { %p1514_p2 = pnand %p1512_p0, %p1742_p1 }
  0x4e   : > { %p1515_p4 = pneg %p1514_p2 }
  0x50   : > { %p1520_p10 = pnand %p1518_p8, %p1515_p4 }
  0x52   : > { %1523 = shalt.err (!%p1520_p10)
}
  0x53   : > { %s1524_s9 = scalar_lea.vmem %s213_s13, 16  ;;  %s1531_s5 = scalar_lea.vmem %s213_s13, 32 }
  0x54   : > { %p1525_p11 = scmp.ne.s32.totalorder %s213_s13, %s1524_s9  ;;  %p1532_p6 = scmp.lt.s32.totalorder %s213_s13, %s213_s13 }
  0x55   : > { %p1533_p7 = scmp.lt.s32.totalorder %s1531_s5, %s1524_s9 }
  0x56   : > { %p1527_p3 = pnand %p1525_p11, %p1742_p1 }
  0x57   : > { %p1534_p9 = por %p1533_p7, %p1532_p6 }
  0x58   : > { %p1528_p5 = pneg %p1527_p3 }
  0x5a   : > { %p1535_p12 = pnand %p1534_p9, %p1528_p5 }
  0x5c   : > { %1538 = shalt.err (!%p1535_p12)
}
  0x5d   : > { %1329 = dma.hbm_to_vmem [thread:$0]  (!%p1728_p13), %s2060_s3, 16, %s213_s13, [#allocation6]  }
  0x5e   : > { %p2076_p0 = scmp.ne.s32.totalorder %s2071_s29, 0 }
  0x5f   : > { %p2077_p2 = scmp.ne.s32.totalorder (!%p2076_p0), %s2072_s30, 0 }
  0x60   : > { %235 = sbr.rel (%p2076_p0) target bundleno = 440 (0x1b8), region = 36 }
  0x67   : > { %1592 = dma.done.wait (%p2077_p2), [#allocation3], 1216  }
  0x68   : > { %1594 = vsyncadd (%p2077_p2), [#allocation3], 4294966080 }
  0x69   : > { %1596 = dma.done.wait (%p2077_p2), [#allocation6], 32  }
  0x6a   : > { %1598 = vsyncadd (%p2077_p2), [#allocation6], 4294967264  ;;  %s1152_s2 = sshll.u32 %s1617_s18, 5  ;;  %v1632_v0 = vmov 0   ;;  %v1397_v1 = vld [vmem:[#allocation2] sm:$0xff]   ;;  %v1398_v2 = vld [vmem:[#allocation2 + $0x8] sm:$0xff]  }
  0x6b   : > { %584 = vmatprep.subr.bf16.mxu0 %v1632_v0  ;;  %1286 = vmatprep.subr.bf16.mxu1 %v1632_v0  ;;  %p271_p13 = scmp.lt.s32.totalorder %s1152_s2, 8191  ;;  %v1399_v3 = vld [vmem:[#allocation2 + $0x10] sm:$0xff]   ;;  %vm531_vm0 = vcmask 195584   ;;  %v1400_v4 = vld [vmem:[#allocation2 + $0x18] sm:$0xff]   ;;  %v1401_v7 = vld [vmem:[#allocation2 + $0x20] sm:$0xff]   ;;  %vm580_vm1 = vcmask 1043456  }
  0x6c   : > { %585 = vmatpush1.bf16.msra.mxu0 %v1397_v1  ;;  %1296 = vmatpush1.bf16.msra.mxu1 %v1397_v1  ;;  %v1402_v8 = vld [vmem:[#allocation2 + $0x28] sm:$0xff]   ;;  %v1403_v9 = vld [vmem:[#allocation2 + $0x30] sm:$0xff]   ;;  %v1404_v10 = vld [vmem:[#allocation2 + $0x38] sm:$0xff]   ;;  %s267_s21 = sand.u32 1, %s1609_s16   ;;  %vm983_vm2 = vcmask 519168   ;;  %s1285_s13 = sshll.u32 %s1617_s18, 11 }
  0x6d   : > { %s2089_s2 = smov (!%p271_p13, %s1152_s2), 8191  ;;  %586 = vmatprep.subr.bf16.mxu0 %v1632_v0  ;;  %1287 = vmatprep.subr.bf16.mxu1 %v1632_v0  ;;  %v1405_v11 = vld [vmem:[#allocation2 + $0x40] sm:$0xff]   ;;  %v1406_v12 = vld [vmem:[#allocation2 + $0x48] ss:$0 sps:$4 sm:$0xff]   ;;  %v1863_v44 = vld [vmem:[#allocation5] ss:$0 sm:$0xff]  ;;  %s1997_s26 = scalar_lea.hbm %s2061_s4, %s1285_s13 }
  0x6e   : > { %s1252_s23 = sshll.u32 %s2089_s2, 3  ;;  %v582_v13 = vsel %vm580_vm1, %v1406_v12, 0  ;;  %v1866_v46 = vld [vmem:[#allocation7] ss:$0 sm:$0xff]  ;;  %s1151_s11 = sshll.u32 %s267_s21, 7 }
  0x6f   : > { %s1813_s7 = scalar_lea.vmem %s2057_s0, %s1252_s23  ;;  %s1878_s12 = scalar_lea.vmem [#allocation8], %s1151_s11 }
  0x70   : > { %587 = vmatpush1.bf16.msra.mxu0 %v1398_v2  ;;  %1297 = vmatpush1.bf16.msra.mxu1 %v1398_v2  ;;  %v1409_v5 = vld [vmem:[%s1813_s7 + $0x4] ss:$8 sps:$4 sm:$0xff]   ;;  %v1407_v14 = vld [vmem:[%s1813_s7] ss:$8 sps:$4 sm:$0xff]   ;;  %v1413_v16 = vld [vmem:[%s1813_s7 + $0x14] ss:$8 sps:$4 sm:$0xff]  }
  0x71   : > { %588 = vmatprep.subr.bf16.mxu0 %v1632_v0  ;;  %1288 = vmatprep.subr.bf16.mxu1 %v1632_v0  ;;  %v1412_v6 = vld [vmem:[%s1813_s7 + $0x84] ss:$8 sps:$4 sm:$0xff]   ;;  %v1410_v15 = vld [vmem:[%s1813_s7 + $0x80] ss:$8 sps:$4 sm:$0xff]   ;;  %v1415_v17 = vld [vmem:[%s1813_s7 + $0x94] ss:$8 sps:$4 sm:$0xff]  }
  0x72   : > { %1197 = vmatprep.mubr.msk.bf16.mxu0 %vm531_vm0, %v1409_v5  ;;  %1205 = vmatprep.mubr.msk.bf16.mxu1 %vm531_vm0, %v1412_v6  ;;  %v1417_v18 = vld [vmem:[%s1813_s7 + $0x10] ss:$8 sps:$4 sm:$0xff]   ;;  %v1419_v20 = vld [vmem:[%s1813_s7 + $0x24] ss:$8 sps:$4 sm:$0xff]   ;;  %v1423_v22 = vld [vmem:[%s1813_s7 + $0x20] ss:$8 sps:$4 sm:$0xff]  }
  0x73   : > { %v1418_v19 = vld [vmem:[%s1813_s7 + $0x90] ss:$8 sps:$4 sm:$0xff]   ;;  %v1421_v21 = vld [vmem:[%s1813_s7 + $0xa4] ss:$8 sps:$4 sm:$0xff]   ;;  %v1424_v23 = vld [vmem:[%s1813_s7 + $0xa0] ss:$8 sps:$4 sm:$0xff]  }
  0x74   : > { %589 = vmatpush1.bf16.msra.mxu0 %v1399_v3  ;;  %1298 = vmatpush1.bf16.msra.mxu1 %v1399_v3  ;;  %v1425_v24 = vld [vmem:[%s1813_s7 + $0x34] ss:$8 sps:$4 sm:$0xff]   ;;  %v1429_v26 = vld [vmem:[%s1813_s7 + $0x30] ss:$8 sps:$4 sm:$0xff]   ;;  %v1431_v28 = vld [vmem:[%s1813_s7 + $0x44] ss:$8 sps:$4 sm:$0xff]  }
  0x75   : > { %590 = vmatprep.subr.bf16.mxu0 %v1632_v0  ;;  %1289 = vmatprep.subr.bf16.mxu1 %v1632_v0  ;;  %v1427_v25 = vld [vmem:[%s1813_s7 + $0xb4] ss:$8 sps:$4 sm:$0xff]   ;;  %v1430_v27 = vld [vmem:[%s1813_s7 + $0xb0] ss:$8 sps:$4 sm:$0xff]   ;;  %v1433_v29 = vld [vmem:[%s1813_s7 + $0xc4] ss:$8 sps:$4 sm:$0xff]  }
  0x76   : > { %v1435_v30 = vld [vmem:[%s1813_s7 + $0x40] ss:$8 sps:$4 sm:$0xff]   ;;  %v1437_v32 = vld [vmem:[%s1813_s7 + $0x54] ss:$8 sps:$4 sm:$0xff]   ;;  %v1441_v34 = vld [vmem:[%s1813_s7 + $0x50] ss:$8 sps:$4 sm:$0xff]  }
  0x77   : > { %v1436_v31 = vld [vmem:[%s1813_s7 + $0xc0] ss:$8 sps:$4 sm:$0xff]   ;;  %v1439_v33 = vld [vmem:[%s1813_s7 + $0xd4] ss:$8 sps:$4 sm:$0xff]   ;;  %v1442_v35 = vld [vmem:[%s1813_s7 + $0xd0] ss:$8 sps:$4 sm:$0xff]  }
  0x78   : > { %591 = vmatpush1.bf16.msra.mxu0 %v1400_v4  ;;  %1299 = vmatpush1.bf16.msra.mxu1 %v1400_v4  ;;  %v1443_v36 = vld [vmem:[%s1813_s7 + $0x64] ss:$8 sps:$4 sm:$0xff]   ;;  %v1447_v38 = vld [vmem:[%s1813_s7 + $0x60] ss:$8 sps:$4 sm:$0xff]   ;;  %v1449_v40 = vld [vmem:[%s1813_s7 + $0x74] ss:$8 sps:$4 sm:$0xff]  }
  0x79   : > { %592 = vmatprep.subr.bf16.mxu0 %v1632_v0  ;;  %1290 = vmatprep.subr.bf16.mxu1 %v1632_v0  ;;  %v1445_v37 = vld [vmem:[%s1813_s7 + $0xe4] ss:$8 sps:$4 sm:$0xff]   ;;  %v1448_v39 = vld [vmem:[%s1813_s7 + $0xe0] ss:$8 sps:$4 sm:$0xff]   ;;  %v1451_v41 = vld [vmem:[%s1813_s7 + $0xf4] ss:$8 sps:$4 sm:$0xff]  }
  0x7a   : > { %v1453_v42 = vld [vmem:[%s1813_s7 + $0x70] ss:$8 sps:$4 sm:$0xff]   ;;  %s1031_s14 = sshll.u32 %s1878_s12, 4  ;;  %s2011_s18 = scalar_lea.sflag [#allocation4], %s267_s21  ;;  %s1999_s14 = int_to_ptr.vmem [resolvable:$true] %s1031_s14 }
  0x7b   : > { %v1454_v43 = vld [vmem:[%s1813_s7 + $0xf0] ss:$8 sps:$4 sm:$0xff]   ;;  %s1539_s6 = scalar_lea.vmem %s1999_s14, 2048  ;;  %p2078_p4 = scmp.ne.s32.totalorder %s2069_s25, 0 }
  0x7c   : > { %593 = vmatpush1.bf16.msra.mxu0 %v1401_v7  ;;  %1300 = vmatpush1.bf16.msra.mxu1 %v1401_v7  ;;  %p1540_p1 = scmp.ne.s32.totalorder %s1999_s14, %s1539_s6  ;;  %s1633_s9 = smov [#allocation8]  }
  0x7d   : > { %594 = vmatprep.subr.bf16.mxu0 %v1632_v0  ;;  %1291 = vmatprep.subr.bf16.mxu1 %v1632_v0  ;;  %s1543_s5 = sshll.u32 %s1633_s9, 4  ;;  %s1544_s5 = int_to_ptr.vmem [resolvable:$false] %s1543_s5 }
  0x7e   : > { %p1541_p8 = pnand %p1540_p1, %p2078_p4  ;;  %s1545_s8 = scalar_lea.vmem %s1544_s5, 4096 }
  0x7f   : > { %p1546_p11 = scmp.lt.s32.totalorder %s1999_s14, %s1544_s5  ;;  %p1547_p3 = scmp.lt.s32.totalorder %s1545_s8, %s1539_s6 }
  0x80   : > { %595 = vmatpush1.bf16.msra.mxu0 %v1402_v8  ;;  %1301 = vmatpush1.bf16.msra.mxu1 %v1402_v8  ;;  %p1542_p10 = pneg %p1541_p8 }
  0x81   : > { %596 = vmatprep.subr.bf16.mxu0 %v1632_v0  ;;  %1292 = vmatprep.subr.bf16.mxu1 %v1632_v0  ;;  %p1548_p5 = por %p1547_p3, %p1546_p11 }
  0x83   : > { %p1549_p6 = pnand %p1548_p5, %p1542_p10 }
  0x84   : > { %597 = vmatpush1.bf16.msra.mxu0 %v1403_v9  ;;  %1302 = vmatpush1.bf16.msra.mxu1 %v1403_v9 }
  0x85   : > { %598 = vmatprep.subr.bf16.mxu0 %v1632_v0  ;;  %1293 = vmatprep.subr.bf16.mxu1 %v1632_v0 }
  0x88   : > { %599 = vmatpush1.bf16.msra.mxu0 %v1404_v10  ;;  %1303 = vmatpush1.bf16.msra.mxu1 %v1404_v10 }
  0x89   : > { %600 = vmatprep.subr.bf16.mxu0 %v1632_v0  ;;  %1294 = vmatprep.subr.bf16.mxu1 %v1632_v0 }
  0x8c   : > { %601 = vmatpush1.bf16.msra.mxu0 %v1405_v11  ;;  %1304 = vmatpush1.bf16.msra.mxu1 %v1405_v11 }
  0x8d   : > { %602 = vmatprep.subr.bf16.mxu0 %v1632_v0  ;;  %1295 = vmatprep.subr.bf16.mxu1 %v1632_v0 }
  0x90   : > { %603 = vmatpush1.bf16.msra.mxu0 %v582_v13  ;;  %1305 = vmatpush1.bf16.msra.mxu1 %v582_v13 }
  0x93   : > { %617 = vmatmul.mubr.bf16.vlgmr.msra.gmra.mrb[0].mxu0 %v1407_v14  ;;  %681 = vmatmul.mubr.bf16.vlgmr.msra.gmra.mrb[0].mxu1 %v1410_v15 }
  0x94   : > { %1198 = vmatprep.mubr.msk.bf16.mxu0 %vm531_vm0, %v1413_v16  ;;  %1206 = vmatprep.mubr.msk.bf16.mxu1 %vm531_vm0, %v1415_v17 }
  0x9b   : > { %625 = vmatmul.mubr.bf16.gmra.mrb[4].mxu0 %v1417_v18  ;;  %689 = vmatmul.mubr.bf16.gmra.mrb[4].mxu1 %v1418_v19 }
  0x9c   : > { %1199 = vmatprep.mubr.msk.bf16.mxu0 %vm531_vm0, %v1419_v20  ;;  %1207 = vmatprep.mubr.msk.bf16.mxu1 %vm531_vm0, %v1421_v21 }
  0xa3   : > { %633 = vmatmul.mubr.bf16.gmra.mrb[8].mxu0 %v1423_v22  ;;  %697 = vmatmul.mubr.bf16.gmra.mrb[8].mxu1 %v1424_v23 }
  0xa4   : > { %1200 = vmatprep.mubr.msk.bf16.mxu0 %vm531_vm0, %v1425_v24  ;;  %1208 = vmatprep.mubr.msk.bf16.mxu1 %vm531_vm0, %v1427_v25 }
  0xab   : > { %641 = vmatmul.mubr.bf16.gmra.mrb[12].mxu0 %v1429_v26  ;;  %705 = vmatmul.mubr.bf16.gmra.mrb[12].mxu1 %v1430_v27 }
  0xac   : > { %1201 = vmatprep.mubr.msk.bf16.mxu0 %vm531_vm0, %v1431_v28  ;;  %1209 = vmatprep.mubr.msk.bf16.mxu1 %vm531_vm0, %v1433_v29 }
  0xb3   : > { %649 = vmatmul.mubr.bf16.gmra.mrb[16].mxu0 %v1435_v30  ;;  %713 = vmatmul.mubr.bf16.gmra.mrb[16].mxu1 %v1436_v31 }
  0xb4   : > { %1202 = vmatprep.mubr.msk.bf16.mxu0 %vm531_vm0, %v1437_v32  ;;  %1210 = vmatprep.mubr.msk.bf16.mxu1 %vm531_vm0, %v1439_v33 }
  0xbb   : > { %657 = vmatmul.mubr.bf16.gmra.mrb[20].mxu0 %v1441_v34  ;;  %721 = vmatmul.mubr.bf16.gmra.mrb[20].mxu1 %v1442_v35 }
  0xbc   : > { %1203 = vmatprep.mubr.msk.bf16.mxu0 %vm531_vm0, %v1443_v36  ;;  %1211 = vmatprep.mubr.msk.bf16.mxu1 %vm531_vm0, %v1445_v37 }
  0xc3   : > { %665 = vmatmul.mubr.bf16.gmra.mrb[24].mxu0 %v1447_v38  ;;  %729 = vmatmul.mubr.bf16.gmra.mrb[24].mxu1 %v1448_v39 }
  0xc4   : > { %1204 = vmatprep.mubr.msk.bf16.mxu0 %vm531_vm0, %v1449_v40  ;;  %1212 = vmatprep.mubr.msk.bf16.mxu1 %vm531_vm0, %v1451_v41 }
  0xcb   : > { %673 = vmatmul.mubr.bf16.gmra.mrb[28].mxu0 %v1453_v42  ;;  %737 = vmatmul.mubr.bf16.gmra.mrb[28].mxu1 %v1454_v43 }
 0x166   : > { %v618_v45 = vpop.f32.mrb[0].mxu0  ;;  %v682_v47 = vpop.f32.mrb[0].mxu1 }
 0x167   : > { %v752_v48 = vmul.f32 %v1863_v44, %v618_v45  ;;  %v768_v49 = vmul.f32 %v1863_v44, %v682_v47  ;;  %v620_v50 = vpop.f32.mrb[1].mxu0  ;;  %v684_v51 = vpop.f32.mrb[1].mxu1 }
 0x168   : > { %v621_v52 = vpop.f32.mrb[2].mxu0  ;;  %v685_v53 = vpop.f32.mrb[2].mxu1 }
 0x169   : > { %v791_v54 = vadd.f32 %v1866_v46, %v752_v48  ;;  %v807_v55 = vadd.f32 %v1866_v46, %v768_v49  ;;  %v753_v56 = vmul.f32 %v1863_v44, %v621_v52  ;;  %v769_v57 = vmul.f32 %v1863_v44, %v685_v53  ;;  %v623_v58 = vpop.f32.mrb[3].mxu0  ;;  %v687_v59 = vpop.f32.mrb[3].mxu1 }
 0x16b   : > { %v823_v60 = vmax.f32 %v791_v54, 0.0  ;;  %v839_v61 = vmax.f32 %v807_v55, 0.0  ;;  %v792_v62 = vadd.f32 %v1866_v46, %v753_v56  ;;  %v808_v63 = vadd.f32 %v1866_v46, %v769_v57 }
 0x16d   : > { %v1253_v0 = vpack.c.bf16 %v823_v60, %v823_v60  ;;  %v1269_v1 = vpack.c.bf16 %v839_v61, %v839_v61  ;;  %v824_v2 = vmax.f32 %v792_v62, 0.0  ;;  %v840_v3 = vmax.f32 %v808_v63, 0.0 }
 0x16e   : > { %v626_v4 = vpop.f32.mrb[4].mxu0  ;;  %v690_v5 = vpop.f32.mrb[4].mxu1 }
 0x16f   : > { %984 = vst.msk [vmem:[%s1878_s12] sm:$0xf] %vm983_vm2, %v1253_v0  ;;  %1000 = vst.msk [vmem:[%s1878_s12 + $0x40] sm:$0xf] %vm983_vm2, %v1269_v1  ;;  %v1254_v6 = vpack.c.bf16 %v824_v2, %v824_v2  ;;  %v1270_v7 = vpack.c.bf16 %v840_v3, %v840_v3  ;;  %v754_v8 = vmul.f32 %v1863_v44, %v626_v4  ;;  %v628_v10 = vpop.f32.mrb[5].mxu0  ;;  %v692_v11 = vpop.f32.mrb[5].mxu1 }
 0x170   : > { %v770_v9 = vmul.f32 %v1863_v44, %v690_v5  ;;  %v629_v12 = vpop.f32.mrb[6].mxu0  ;;  %v693_v13 = vpop.f32.mrb[6].mxu1 }
 0x171   : > { %985 = vst.msk [vmem:[%s1878_s12 + $0x4] sm:$0xf] %vm983_vm2, %v1254_v6  ;;  %1001 = vst.msk [vmem:[%s1878_s12 + $0x44] sm:$0xf] %vm983_vm2, %v1270_v7  ;;  %v793_v14 = vadd.f32 %v1866_v46, %v754_v8  ;;  %v755_v16 = vmul.f32 %v1863_v44, %v629_v12  ;;  %v771_v17 = vmul.f32 %v1863_v44, %v693_v13  ;;  %v631_v18 = vpop.f32.mrb[7].mxu0  ;;  %v695_v19 = vpop.f32.mrb[7].mxu1 }
 0x172   : > { %v809_v15 = vadd.f32 %v1866_v46, %v770_v9 }
 0x173   : > { %v825_v20 = vmax.f32 %v793_v14, 0.0  ;;  %v794_v22 = vadd.f32 %v1866_v46, %v755_v16  ;;  %v810_v23 = vadd.f32 %v1866_v46, %v771_v17 }
 0x174   : > { %v841_v21 = vmax.f32 %v809_v15, 0.0 }
 0x175   : > { %v1255_v24 = vpack.c.bf16 %v825_v20, %v825_v20  ;;  %v826_v26 = vmax.f32 %v794_v22, 0.0  ;;  %v842_v27 = vmax.f32 %v810_v23, 0.0 }
 0x176   : > { %v1271_v25 = vpack.c.bf16 %v841_v21, %v841_v21  ;;  %v634_v28 = vpop.f32.mrb[8].mxu0  ;;  %v698_v29 = vpop.f32.mrb[8].mxu1 }
 0x177   : > { %986 = vst.msk [vmem:[%s1878_s12 + $0x8] sm:$0xf] %vm983_vm2, %v1255_v24  ;;  %v1256_v30 = vpack.c.bf16 %v826_v26, %v826_v26  ;;  %v1272_v31 = vpack.c.bf16 %v842_v27, %v842_v27  ;;  %v756_v32 = vmul.f32 %v1863_v44, %v634_v28  ;;  %v772_v33 = vmul.f32 %v1863_v44, %v698_v29  ;;  %v636_v34 = vpop.f32.mrb[9].mxu0  ;;  %v700_v35 = vpop.f32.mrb[9].mxu1 }
 0x178   : > { %1002 = vst.msk [vmem:[%s1878_s12 + $0x48] sm:$0xf] %vm983_vm2, %v1271_v25  ;;  %v637_v36 = vpop.f32.mrb[10].mxu0  ;;  %v701_v37 = vpop.f32.mrb[10].mxu1 }
 0x179   : > { %987 = vst.msk [vmem:[%s1878_s12 + $0xc] sm:$0xf] %vm983_vm2, %v1256_v30  ;;  %1003 = vst.msk [vmem:[%s1878_s12 + $0x4c] sm:$0xf] %vm983_vm2, %v1272_v31  ;;  %v795_v38 = vadd.f32 %v1866_v46, %v756_v32  ;;  %v811_v39 = vadd.f32 %v1866_v46, %v772_v33  ;;  %v757_v40 = vmul.f32 %v1863_v44, %v637_v36  ;;  %v639_v42 = vpop.f32.mrb[11].mxu0  ;;  %v703_v43 = vpop.f32.mrb[11].mxu1 }
 0x17a   : > { %v773_v41 = vmul.f32 %v1863_v44, %v701_v37 }
 0x17b   : > { %v827_v45 = vmax.f32 %v795_v38, 0.0  ;;  %v843_v47 = vmax.f32 %v811_v39, 0.0  ;;  %v796_v48 = vadd.f32 %v1866_v46, %v757_v40 }
 0x17c   : > { %v812_v49 = vadd.f32 %v1866_v46, %v773_v41 }
 0x17d   : > { %v1257_v50 = vpack.c.bf16 %v827_v45, %v827_v45  ;;  %v1273_v51 = vpack.c.bf16 %v843_v47, %v843_v47  ;;  %v828_v52 = vmax.f32 %v796_v48, 0.0 }
 0x17e   : > { %v844_v53 = vmax.f32 %v812_v49, 0.0  ;;  %v642_v54 = vpop.f32.mrb[12].mxu0  ;;  %v706_v55 = vpop.f32.mrb[12].mxu1 }
 0x17f   : > { %988 = vst.msk [vmem:[%s1878_s12 + $0x10] sm:$0xf] %vm983_vm2, %v1257_v50  ;;  %1004 = vst.msk [vmem:[%s1878_s12 + $0x50] sm:$0xf] %vm983_vm2, %v1273_v51  ;;  %v1258_v56 = vpack.c.bf16 %v828_v52, %v828_v52  ;;  %v758_v58 = vmul.f32 %v1863_v44, %v642_v54  ;;  %v774_v59 = vmul.f32 %v1863_v44, %v706_v55  ;;  %v644_v60 = vpop.f32.mrb[13].mxu0  ;;  %v708_v61 = vpop.f32.mrb[13].mxu1 }
 0x180   : > { %v1274_v57 = vpack.c.bf16 %v844_v53, %v844_v53  ;;  %v645_v62 = vpop.f32.mrb[14].mxu0  ;;  %v709_v63 = vpop.f32.mrb[14].mxu1 }
 0x181   : > { %989 = vst.msk [vmem:[%s1878_s12 + $0x14] sm:$0xf] %vm983_vm2, %v1258_v56  ;;  %v797_v0 = vadd.f32 %v1866_v46, %v758_v58  ;;  %v813_v1 = vadd.f32 %v1866_v46, %v774_v59  ;;  %v759_v2 = vmul.f32 %v1863_v44, %v645_v62  ;;  %v775_v3 = vmul.f32 %v1863_v44, %v709_v63  ;;  %v647_v4 = vpop.f32.mrb[15].mxu0  ;;  %v711_v5 = vpop.f32.mrb[15].mxu1 }
 0x182   : > { %1005 = vst.msk [vmem:[%s1878_s12 + $0x54] sm:$0xf] %vm983_vm2, %v1274_v57 }
 0x183   : > { %v829_v6 = vmax.f32 %v797_v0, 0.0  ;;  %v845_v7 = vmax.f32 %v813_v1, 0.0  ;;  %v798_v8 = vadd.f32 %v1866_v46, %v759_v2  ;;  %v814_v9 = vadd.f32 %v1866_v46, %v775_v3 }
 0x185   : > { %v1259_v10 = vpack.c.bf16 %v829_v6, %v829_v6  ;;  %v1275_v11 = vpack.c.bf16 %v845_v7, %v845_v7  ;;  %v830_v12 = vmax.f32 %v798_v8, 0.0  ;;  %v846_v13 = vmax.f32 %v814_v9, 0.0 }
 0x186   : > { %v650_v14 = vpop.f32.mrb[16].mxu0  ;;  %v714_v15 = vpop.f32.mrb[16].mxu1 }
 0x187   : > { %990 = vst.msk [vmem:[%s1878_s12 + $0x18] sm:$0xf] %vm983_vm2, %v1259_v10  ;;  %1006 = vst.msk [vmem:[%s1878_s12 + $0x58] sm:$0xf] %vm983_vm2, %v1275_v11  ;;  %v1260_v16 = vpack.c.bf16 %v830_v12, %v830_v12  ;;  %v1276_v17 = vpack.c.bf16 %v846_v13, %v846_v13  ;;  %v760_v18 = vmul.f32 %v1863_v44, %v650_v14  ;;  %v652_v20 = vpop.f32.mrb[17].mxu0  ;;  %v716_v21 = vpop.f32.mrb[17].mxu1 }
 0x188   : > { %v776_v19 = vmul.f32 %v1863_v44, %v714_v15  ;;  %v653_v22 = vpop.f32.mrb[18].mxu0  ;;  %v717_v23 = vpop.f32.mrb[18].mxu1 }
 0x189   : > { %991 = vst.msk [vmem:[%s1878_s12 + $0x1c] sm:$0xf] %vm983_vm2, %v1260_v16  ;;  %1007 = vst.msk [vmem:[%s1878_s12 + $0x5c] sm:$0xf] %vm983_vm2, %v1276_v17  ;;  %v799_v24 = vadd.f32 %v1866_v46, %v760_v18  ;;  %v761_v26 = vmul.f32 %v1863_v44, %v653_v22  ;;  %v777_v27 = vmul.f32 %v1863_v44, %v717_v23  ;;  %v655_v28 = vpop.f32.mrb[19].mxu0  ;;  %v719_v29 = vpop.f32.mrb[19].mxu1 }
 0x18a   : > { %v815_v25 = vadd.f32 %v1866_v46, %v776_v19 }
 0x18b   : > { %v831_v30 = vmax.f32 %v799_v24, 0.0  ;;  %v800_v32 = vadd.f32 %v1866_v46, %v761_v26  ;;  %v816_v33 = vadd.f32 %v1866_v46, %v777_v27 }
 0x18c   : > { %v847_v31 = vmax.f32 %v815_v25, 0.0 }
 0x18d   : > { %v1261_v34 = vpack.c.bf16 %v831_v30, %v831_v30  ;;  %v832_v36 = vmax.f32 %v800_v32, 0.0  ;;  %v848_v37 = vmax.f32 %v816_v33, 0.0 }
 0x18e   : > { %v1277_v35 = vpack.c.bf16 %v847_v31, %v847_v31  ;;  %v658_v38 = vpop.f32.mrb[20].mxu0  ;;  %v722_v39 = vpop.f32.mrb[20].mxu1 }
 0x18f   : > { %992 = vst.msk [vmem:[%s1878_s12 + $0x20] sm:$0xf] %vm983_vm2, %v1261_v34  ;;  %v1262_v40 = vpack.c.bf16 %v832_v36, %v832_v36  ;;  %v1278_v41 = vpack.c.bf16 %v848_v37, %v848_v37  ;;  %v762_v42 = vmul.f32 %v1863_v44, %v658_v38  ;;  %v778_v43 = vmul.f32 %v1863_v44, %v722_v39  ;;  %v660_v45 = vpop.f32.mrb[21].mxu0  ;;  %v724_v47 = vpop.f32.mrb[21].mxu1 }
 0x190   : > { %1008 = vst.msk [vmem:[%s1878_s12 + $0x60] sm:$0xf] %vm983_vm2, %v1277_v35  ;;  %v661_v48 = vpop.f32.mrb[22].mxu0  ;;  %v725_v49 = vpop.f32.mrb[22].mxu1 }
 0x191   : > { %993 = vst.msk [vmem:[%s1878_s12 + $0x24] sm:$0xf] %vm983_vm2, %v1262_v40  ;;  %1009 = vst.msk [vmem:[%s1878_s12 + $0x64] sm:$0xf] %vm983_vm2, %v1278_v41  ;;  %v801_v50 = vadd.f32 %v1866_v46, %v762_v42  ;;  %v817_v51 = vadd.f32 %v1866_v46, %v778_v43  ;;  %v763_v52 = vmul.f32 %v1863_v44, %v661_v48  ;;  %v663_v54 = vpop.f32.mrb[23].mxu0  ;;  %v727_v55 = vpop.f32.mrb[23].mxu1 }
 0x192   : > { %v779_v53 = vmul.f32 %v1863_v44, %v725_v49 }
 0x193   : > { %v833_v56 = vmax.f32 %v801_v50, 0.0  ;;  %v849_v57 = vmax.f32 %v817_v51, 0.0  ;;  %v802_v58 = vadd.f32 %v1866_v46, %v763_v52 }
 0x194   : > { %v818_v59 = vadd.f32 %v1866_v46, %v779_v53 }
 0x195   : > { %v1263_v60 = vpack.c.bf16 %v833_v56, %v833_v56  ;;  %v1279_v61 = vpack.c.bf16 %v849_v57, %v849_v57  ;;  %v834_v62 = vmax.f32 %v802_v58, 0.0 }
 0x196   : > { %v850_v63 = vmax.f32 %v818_v59, 0.0  ;;  %v666_v0 = vpop.f32.mrb[24].mxu0  ;;  %v730_v1 = vpop.f32.mrb[24].mxu1 }
 0x197   : > { %994 = vst.msk [vmem:[%s1878_s12 + $0x28] sm:$0xf] %vm983_vm2, %v1263_v60  ;;  %1010 = vst.msk [vmem:[%s1878_s12 + $0x68] sm:$0xf] %vm983_vm2, %v1279_v61  ;;  %v1264_v2 = vpack.c.bf16 %v834_v62, %v834_v62  ;;  %v764_v4 = vmul.f32 %v1863_v44, %v666_v0  ;;  %v780_v5 = vmul.f32 %v1863_v44, %v730_v1  ;;  %v668_v6 = vpop.f32.mrb[25].mxu0  ;;  %v732_v7 = vpop.f32.mrb[25].mxu1 }
 0x198   : > { %v1280_v3 = vpack.c.bf16 %v850_v63, %v850_v63  ;;  %v669_v8 = vpop.f32.mrb[26].mxu0  ;;  %v733_v9 = vpop.f32.mrb[26].mxu1 }
 0x199   : > { %995 = vst.msk [vmem:[%s1878_s12 + $0x2c] sm:$0xf] %vm983_vm2, %v1264_v2  ;;  %v803_v10 = vadd.f32 %v1866_v46, %v764_v4  ;;  %v819_v11 = vadd.f32 %v1866_v46, %v780_v5  ;;  %v765_v12 = vmul.f32 %v1863_v44, %v669_v8  ;;  %v781_v13 = vmul.f32 %v1863_v44, %v733_v9  ;;  %v671_v14 = vpop.f32.mrb[27].mxu0  ;;  %v735_v15 = vpop.f32.mrb[27].mxu1 }
 0x19a   : > { %1011 = vst.msk [vmem:[%s1878_s12 + $0x6c] sm:$0xf] %vm983_vm2, %v1280_v3 }
 0x19b   : > { %v835_v16 = vmax.f32 %v803_v10, 0.0  ;;  %v851_v17 = vmax.f32 %v819_v11, 0.0  ;;  %v804_v18 = vadd.f32 %v1866_v46, %v765_v12  ;;  %v820_v19 = vadd.f32 %v1866_v46, %v781_v13 }
 0x19d   : > { %v1265_v20 = vpack.c.bf16 %v835_v16, %v835_v16  ;;  %v1281_v21 = vpack.c.bf16 %v851_v17, %v851_v17  ;;  %v836_v22 = vmax.f32 %v804_v18, 0.0  ;;  %v852_v23 = vmax.f32 %v820_v19, 0.0 }
 0x19e   : > { %v674_v24 = vpop.f32.mrb[28].mxu0  ;;  %v738_v25 = vpop.f32.mrb[28].mxu1 }
 0x19f   : > { %996 = vst.msk [vmem:[%s1878_s12 + $0x30] sm:$0xf] %vm983_vm2, %v1265_v20  ;;  %1012 = vst.msk [vmem:[%s1878_s12 + $0x70] sm:$0xf] %vm983_vm2, %v1281_v21  ;;  %v1266_v26 = vpack.c.bf16 %v836_v22, %v836_v22  ;;  %v1282_v27 = vpack.c.bf16 %v852_v23, %v852_v23  ;;  %v766_v28 = vmul.f32 %v1863_v44, %v674_v24  ;;  %v676_v30 = vpop.f32.mrb[29].mxu0  ;;  %v740_v31 = vpop.f32.mrb[29].mxu1 }
 0x1a0   : > { %v782_v29 = vmul.f32 %v1863_v44, %v738_v25  ;;  %v677_v32 = vpop.f32.mrb[30].mxu0  ;;  %v741_v33 = vpop.f32.mrb[30].mxu1 }
 0x1a1   : > { %997 = vst.msk [vmem:[%s1878_s12 + $0x34] sm:$0xf] %vm983_vm2, %v1266_v26  ;;  %1013 = vst.msk [vmem:[%s1878_s12 + $0x74] sm:$0xf] %vm983_vm2, %v1282_v27  ;;  %v805_v34 = vadd.f32 %v1866_v46, %v766_v28  ;;  %v767_v36 = vmul.f32 %v1863_v44, %v677_v32  ;;  %v783_v37 = vmul.f32 %v1863_v44, %v741_v33  ;;  %v679_v38 = vpop.f32.mrb[31].mxu0  ;;  %v743_v39 = vpop.f32.mrb[31].mxu1 }
 0x1a2   : > { %v821_v35 = vadd.f32 %v1866_v46, %v782_v29 }
 0x1a3   : > { %v837_v40 = vmax.f32 %v805_v34, 0.0  ;;  %v806_v42 = vadd.f32 %v1866_v46, %v767_v36  ;;  %v822_v43 = vadd.f32 %v1866_v46, %v783_v37 }
 0x1a4   : > { %v853_v41 = vmax.f32 %v821_v35, 0.0 }
 0x1a5   : > { %v1267_v45 = vpack.c.bf16 %v837_v40, %v837_v40  ;;  %v838_v48 = vmax.f32 %v806_v42, 0.0  ;;  %v854_v49 = vmax.f32 %v822_v43, 0.0 }
 0x1a6   : > { %v1283_v47 = vpack.c.bf16 %v853_v41, %v853_v41 }
 0x1a7   : > { %998 = vst.msk [vmem:[%s1878_s12 + $0x38] sm:$0xf] %vm983_vm2, %v1267_v45  ;;  %v1268_v44 = vpack.c.bf16 %v838_v48, %v838_v48  ;;  %v1284_v46 = vpack.c.bf16 %v854_v49, %v854_v49 }
 0x1a8   : > { %1014 = vst.msk [vmem:[%s1878_s12 + $0x78] sm:$0xf] %vm983_vm2, %v1283_v47 }
 0x1a9   : > { %999 = vst.msk [vmem:[%s1878_s12 + $0x3c] sm:$0xf] %vm983_vm2, %v1268_v44  ;;  %1015 = vst.msk [vmem:[%s1878_s12 + $0x7c] sm:$0xf] %vm983_vm2, %v1284_v46 }
 0x1aa   : > { %1552 = shalt.err (!%p1549_p6)
}
 0x1ab   : > { %s1553_s10 = scalar_lea.hbm %s1997_s26, 2048  ;;  %s1557_s29 = scalar_lea.hbm %s2061_s4, 524288 }
 0x1ac   : > { %p1554_p7 = scmp.ne.s32.totalorder %s1997_s26, %s1553_s10  ;;  %p1558_p0 = scmp.lt.u32.totalorder %s1997_s26, %s2061_s4 }
 0x1ad   : > { %p1559_p2 = scmp.lt.u32.totalorder %s1557_s29, %s1553_s10  ;;  %p1561_p1 = scmp.lt.u32.totalorder %s1553_s10, %s1997_s26 }
 0x1ae   : > { %p1555_p9 = pnand %p1554_p7, %p2078_p4 }
 0x1af   : > { %p1560_p13 = por %p1559_p2, %p1558_p0 }
 0x1b0   : > { %p1556_p12 = pneg %p1555_p9 }
 0x1b1   : > { %p1562_p8 = por %p1561_p1, %p1560_p13 }
 0x1b3   : > { %p1563_p10 = pnand %p1562_p8, %p1556_p12 }
 0x1b5   : > { %1566 = shalt.err (!%p1563_p10)
}
 0x1b6   : > { %s1634_s21 = smov 64   ;;  %s1635_s11 = smov 4  }
 0x1b7   : > { %1318 = dma.vmem_to_hbm [thread:$0]  (%p2078_p4), %s1999_s14, 2048, %s1997_s26, %s2011_s18, %s1634_s21, %s1634_s21, %s1635_s11  }
 0x1b8 PF: > { %p1340_p11 = scmp.ge.s32.totalorder %s1625_s20, 2  ;;  %s1046_s12 = sand.u32 1, %s1605_s15  }
 0x1b9   : > { %p2079_p3 = scmp.ne.s32.totalorder %s2070_s27, 0  ;;  %s1047_s13 = scalar_lea.sflag [#allocation4], %s1046_s12 }
 0x1bb   : > { %p1331_p5 = pnand %p1340_p11, %p2079_p3 }
 0x1bd   : > { %1600 = dma.done.wait (!%p1331_p5), %s1047_s13, 2048  }
 0x1be   : > { %1602 = vsyncadd (!%p1331_p5), %s1047_s13, 4294965248  ;;  %s19_s20 = sadd.s32 1, %s1625_s20   ;;  %s2080_s25 = sld [smem:[#allocation12_spill]] }
 0x1bf   : > { %p16_p6 = scmp.ge.s32.totalorder %s19_s20, 258   ;;  %s2081_s15 = smov %s1609_s16 }
 0x1c0   : > { %s2082_s16 = smov %s1613_s17  ;;  %s2083_s17 = smov %s1714_s28 }
 0x1c1   : > { %s2084_s18 = smov %s1621_s19  ;;  %18 = sbr.rel (!%p16_p6) target bundleno = 8 (0x8), region = 87 }
 0x1c4   : > { %s2085_s19 = smov %s2080_s25 }
 0x1c8   :  { %1052 = vsyncpa [#allocation3], 1 }
 0x1c9   :  { %1054 = vsyncpa [#allocation3 + $0x1], 1 }
 0x1ca   :  { %1055 = vsyncpa [#allocation6], 1 }
 0x1cb   :  { %1056 = vsyncpa [#allocation4], 1 }
 0x1cc   :  { %1058 = vsyncpa [#allocation4 + $0x1], 1 }

</bundles_post_ra>
